<compile_context>
chip_gen: v7x
topology: tpu7x:2x2x1
jax: 0.10.0
libtpu: 0.0.40
codegen_flags: <defaults>
</compile_context>

<pallas_src>
import jax
import jax.numpy as jnp
from jax.experimental import pallas as pl
from jax.experimental.pallas import tpu as pltpu


def _round_up(n: int, m: int) -> int:
    return -(-n // m) * m


def critic_twin_kernel(x_ref, w1_ref, b1_ref, w2_ref, b2_ref,
                       w3m_ref, b3m_ref, out_ref):
    # Layer 1: single merged matmul over concat([state, action]); the state
    # normalization is pre-folded into w1 / b1.  Bias + ReLU in f32.
    h1 = jnp.dot(x_ref[...], w1_ref[...], preferred_element_type=jnp.float32)
    h1 = jnp.maximum(h1 + b1_ref[...], 0.0)

    # Layer 2 (dominant matmul): compute-dtype operands, f32 accumulation.
    h2 = jnp.dot(h1.astype(w2_ref.dtype), w2_ref[...],
                 preferred_element_type=jnp.float32)
    h2 = jnp.maximum(h2 + b2_ref[...], 0.0)

    # Ensemble-mean head (single output column): VPU multiply by the
    # pre-averaged w3 row + XLU lane reduction instead of an N=1 MXU matmul.
    q = jnp.sum(h2 * w3m_ref[...], axis=-1, keepdims=True) + b3m_ref[...]
    out_ref[...] = q.astype(out_ref.dtype)


def prepare_inference_params(params, compute_dtype=jnp.bfloat16):
    """Fold state normalization into layer 1, merge the layer-1 weight halves,
    fuse the ensemble mean into a single output row, zero-pad hidden dims to
    multiples of 128 lanes, and cast matmul weights to `compute_dtype`.

    Hoisted out of the forward path: call once, and RE-RUN whenever the
    running state_avg / state_std statistics are updated."""
    f32 = jnp.float32
    state_dim = params["state_avg"].shape[0]
    inv_std = 1.0 / params["state_std"].astype(f32)

    w1 = params["w1"].astype(f32)
    w1s = w1[:state_dim] * inv_std[:, None]          # fold 1/std into weights
    w1a = w1[state_dim:]
    b1 = params["b1"].astype(f32) - (
        params["state_avg"].astype(f32) * inv_std) @ w1[:state_dim]
    w1m = jnp.concatenate([w1s, w1a], axis=0)        # merged layer-1 weight

    w2 = params["w2"].astype(f32)
    b2 = params["b2"].astype(f32)

    # Ensemble mean fused by linearity: mean(h2 @ W3 + b3) == h2 @ mean(W3) + mean(b3)
    w3m = params["w3"].astype(f32).mean(axis=1)      # (h2,)
    b3m = jnp.reshape(params["b3"].astype(f32).mean(), (1, 1))

    h1, h2 = w2.shape
    h1p, h2p = _round_up(h1, 128), _round_up(h2, 128)
    return {
        "w1": jnp.pad(w1m, ((0, 0), (0, h1p - h1))).astype(compute_dtype),
        "b1": jnp.pad(b1, (0, h1p - h1))[None, :],                    # f32
        "w2": jnp.pad(w2, ((0, h1p - h1), (0, h2p - h2))).astype(compute_dtype),
        "b2": jnp.pad(b2, (0, h2p - h2))[None, :],                    # f32
        "w3m": jnp.pad(w3m, (0, h2p - h2))[None, :],                  # f32 (1, h2p)
        "b3m": b3m,                                                   # f32 (1, 1)
    }


def _select_tile(batch: int, tile_b: int) -> int:
    """Batch tile: multiple of 16 sublanes (bf16 packing) and at least two grid
    tiles so the 'parallel' batch axis can shard across both v7x TensorCores
    (neutral on single-TC v5e/v6e)."""
    tile_b = max(16, (tile_b // 16) * 16)
    return min(tile_b, _round_up(-(-batch // 2), 16))


def critic_twin_forward(state, action, prepared, *, tile_b=1024):
    """Pallas wrapper. `prepared` comes from prepare_inference_params().
    Batch-tiled, pipelined grid; weights VMEM-resident and single-buffered."""
    B = state.shape[0]
    p = prepared
    compute_dtype = p["w1"].dtype

    # Single pre-concatenated input stream (layer-1 merge).
    x = jnp.concatenate([state, action], axis=1).astype(compute_dtype)
    in_dim = x.shape[1]

    tile = _select_tile(B, tile_b)
    n_tiles = -(-B // tile)
    bp = n_tiles * tile
    if bp != B:
        x = jnp.pad(x, ((0, bp - B), (0, 0)))

    weights = (p["w1"], p["b1"], p["w2"], p["b2"], p["w3m"], p["b3m"])

    def resident_spec(w):
        nd = w.ndim
        # Constant block index => stays in VMEM across the grid; Buffered(1)
        # avoids a useless second buffer (matters on v7x's 64 MiB VMEM).
        return pl.BlockSpec(w.shape, lambda i, _nd=nd: (0,) * _nd,
                            pipeline_mode=pl.Buffered(1))

    in_specs = [pl.BlockSpec((tile, in_dim), lambda i: (i, 0))] + [
        resident_spec(w) for w in weights]
    out_spec = pl.BlockSpec((tile, 1), lambda i: (i, 0))

    out = pl.pallas_call(
        critic_twin_kernel,
        out_shape=jax.ShapeDtypeStruct((bp, 1), jnp.float32),
        grid=(n_tiles,),
        in_specs=in_specs,
        out_specs=out_spec,
        compiler_params=pltpu.CompilerParams(
            dimension_semantics=("parallel",)),
    )(x, *weights)
    return out[:B]


def init_params(key, state_dim, action_dim, net_dims, num_ensembles):
    """Synthetic init matching CriticTwin parameter shapes (non-trivial
    state_avg/state_std so the normalization fold is actually exercised)."""
    dims = [state_dim + action_dim, *net_dims, num_ensembles]
    keys = jax.random.split(key, len(dims) + 1)
    ws, bs = [], []
    for i in range(len(dims) - 1):
        w = jax.random.normal(keys[i], (dims[i], dims[i + 1]),
                              dtype=jnp.float32) * 0.1
        b = jnp.full((dims[i + 1],), 1e-6, dtype=jnp.float32)
        ws.append(w)
        bs.append(b)
    state_avg = 0.1 * jax.random.normal(keys[-2], (state_dim,), jnp.float32)
    state_std = 1.0 + 0.5 * jnp.abs(
        jax.random.normal(keys[-1], (state_dim,), jnp.float32))
    return {
        "state_avg": state_avg, "state_std": state_std,
        "w1": ws[0], "b1": bs[0],
        "w2": ws[1], "b2": bs[1],
        "w3": ws[2], "b3": bs[2],
    }


def reference_forward(state, action, params):
    """Pure-JAX reference of CriticTwin.forward (unfolded, exact module math)."""
    s = (state - params["state_avg"]) / params["state_std"]
    x = jnp.concatenate([s, action], axis=1)
    h1 = jnp.maximum(x @ params["w1"] + params["b1"], 0.0)
    h2 = jnp.maximum(h1 @ params["w2"] + params["b2"], 0.0)
    q = h2 @ params["w3"] + params["b3"]
    return q.mean(axis=-1, keepdims=True)


if __name__ == "__main__":
    # Small shapes consistent with the module.
    B = 48
    state_dim = 16
    action_dim = 8
    net_dims = [32, 32]
    num_ensembles = 8

    key = jax.random.PRNGKey(0)
    k_state, k_action, k_param = jax.random.split(key, 3)

    state = jax.random.normal(k_state, (B, state_dim), dtype=jnp.float32)
    action = jax.random.normal(k_action, (B, action_dim), dtype=jnp.float32)
    params = init_params(k_param, state_dim, action_dim, net_dims, num_ensembles)

    ref = reference_forward(state, action, params)

    # f32 compute path: matches the unfolded reference tightly (fold-only
    # fp-reordering differences). tile_b=16 -> 3 batch tiles here, exercising
    # the pipelined parallel grid (production default is tile_b=1024).
    prep_f32 = prepare_inference_params(params, compute_dtype=jnp.float32)
    val_f32 = jax.block_until_ready(
        critic_twin_forward(state, action, prep_f32, tile_b=16))
    assert val_f32.shape == (B, 1)
    assert jnp.allclose(val_f32, ref, atol=1e-4, rtol=1e-4), (
        float(jnp.max(jnp.abs(val_f32 - ref))))

    # bf16 compute path (production default): prep hoisted, forward jitted.
    prep_bf16 = prepare_inference_params(params, compute_dtype=jnp.bfloat16)
    fwd = jax.jit(lambda s, a, p: critic_twin_forward(s, a, p, tile_b=16))
    val_bf16 = jax.block_until_ready(fwd(state, action, prep_bf16))
    assert val_bf16.shape == (B, 1)
    assert jnp.allclose(val_bf16, ref, atol=2e-2, rtol=2e-2), (
        float(jnp.max(jnp.abs(val_bf16 - ref))))

    print("KERNEL_OK")
</pallas_src>

<mosaic_0001>
module attributes {stable_mosaic.version = 11 : i64} {
  func.func @critic_twin_kernel(%arg0: i32, %arg1: memref<16x24xf32, #tpu.memory_space<vmem>>, %arg2: memref<24x128xf32, #tpu.memory_space<vmem>>, %arg3: memref<1x128xf32, #tpu.memory_space<vmem>>, %arg4: memref<128x128xf32, #tpu.memory_space<vmem>>, %arg5: memref<1x128xf32, #tpu.memory_space<vmem>>, %arg6: memref<1x128xf32, #tpu.memory_space<vmem>>, %arg7: memref<1x1xf32, #tpu.memory_space<vmem>>, %arg8: memref<16x1xf32, #tpu.memory_space<vmem>>) attributes {dimension_semantics = [#tpu.dimension_semantics<parallel>], iteration_bounds = array<i64: 3>, scalar_prefetch = 0 : i64, scratch_operands = 0 : i64, tpu.core_type = #tpu.core_type<tc>, window_params = [{transform_indices = @transform_0, window_bounds = array<i64: 16, 24>}, {pipeline_mode = #tpu.pipeline_mode<synchronous>, transform_indices = @transform_1, window_bounds = array<i64: 24, 128>}, {pipeline_mode = #tpu.pipeline_mode<synchronous>, transform_indices = @transform_2, window_bounds = array<i64: 1, 128>}, {pipeline_mode = #tpu.pipeline_mode<synchronous>, transform_indices = @transform_3, window_bounds = array<i64: 128, 128>}, {pipeline_mode = #tpu.pipeline_mode<synchronous>, transform_indices = @transform_4, window_bounds = array<i64: 1, 128>}, {pipeline_mode = #tpu.pipeline_mode<synchronous>, transform_indices = @transform_5, window_bounds = array<i64: 1, 128>}, {pipeline_mode = #tpu.pipeline_mode<synchronous>, transform_indices = @transform_6, window_bounds = array<i64: 1, 1>}, {transform_indices = @transform_7, window_bounds = array<i64: 16, 1>}]} {
    %c0 = arith.constant 0 : index
    %c0_0 = arith.constant 0 : index
    %0 = vector.load %arg1[%c0, %c0_0] : memref<16x24xf32, #tpu.memory_space<vmem>>, vector<16x24xf32>
    %c0_1 = arith.constant 0 : index
    %c0_2 = arith.constant 0 : index
    %1 = vector.load %arg2[%c0_1, %c0_2] : memref<24x128xf32, #tpu.memory_space<vmem>>, vector<24x128xf32>
    %cst = arith.constant dense<0.000000e+00> : vector<16x128xf32>
    %2 = tpu.matmul %0, %1, %cst {dimension_numbers = #tpu.dot_dimension_numbers<[1], [0], [0], [1], [0, 0, 1, 1], [], []>} : vector<16x24xf32>, vector<24x128xf32>, vector<16x128xf32> -> vector<16x128xf32>
    %c0_3 = arith.constant 0 : index
    %c0_4 = arith.constant 0 : index
    %3 = vector.load %arg3[%c0_3, %c0_4] : memref<1x128xf32, #tpu.memory_space<vmem>>, vector<1x128xf32>
    %4 = vector.broadcast %3 : vector<1x128xf32> to vector<16x128xf32>
    %5 = arith.addf %2, %4 : vector<16x128xf32>
    %cst_5 = arith.constant 0.000000e+00 : f32
    %6 = vector.broadcast %cst_5 : f32 to vector<16x128xf32>
    %7 = arith.maximumf %5, %6 : vector<16x128xf32>
    %c0_6 = arith.constant 0 : index
    %c0_7 = arith.constant 0 : index
    %8 = vector.load %arg4[%c0_6, %c0_7] : memref<128x128xf32, #tpu.memory_space<vmem>>, vector<128x128xf32>
    %cst_8 = arith.constant dense<0.000000e+00> : vector<16x128xf32>
    %9 = tpu.matmul %7, %8, %cst_8 {dimension_numbers = #tpu.dot_dimension_numbers<[1], [0], [0], [1], [0, 0, 1, 1], [], []>} : vector<16x128xf32>, vector<128x128xf32>, vector<16x128xf32> -> vector<16x128xf32>
    %c0_9 = arith.constant 0 : index
    %c0_10 = arith.constant 0 : index
    %10 = vector.load %arg5[%c0_9, %c0_10] : memref<1x128xf32, #tpu.memory_space<vmem>>, vector<1x128xf32>
    %11 = vector.broadcast %10 : vector<1x128xf32> to vector<16x128xf32>
    %12 = arith.addf %9, %11 : vector<16x128xf32>
    %cst_11 = arith.constant 0.000000e+00 : f32
    %13 = vector.broadcast %cst_11 : f32 to vector<16x128xf32>
    %14 = arith.maximumf %12, %13 : vector<16x128xf32>
    %c0_12 = arith.constant 0 : index
    %c0_13 = arith.constant 0 : index
    %15 = vector.load %arg6[%c0_12, %c0_13] : memref<1x128xf32, #tpu.memory_space<vmem>>, vector<1x128xf32>
    %16 = vector.broadcast %15 : vector<1x128xf32> to vector<16x128xf32>
    %17 = arith.mulf %14, %16 : vector<16x128xf32>
    %cst_14 = arith.constant dense<0.000000e+00> : vector<16xf32>
    %18 = vector.multi_reduction <add>, %17, %cst_14 [1] : vector<16x128xf32> to vector<16xf32>
    %19 = vector.shape_cast %18 : vector<16xf32> to vector<16x1xf32>
    %c0_15 = arith.constant 0 : index
    %c0_16 = arith.constant 0 : index
    %20 = vector.load %arg7[%c0_15, %c0_16] : memref<1x1xf32, #tpu.memory_space<vmem>>, vector<1x1xf32>
    %21 = vector.broadcast %20 : vector<1x1xf32> to vector<16x1xf32>
    %22 = arith.addf %19, %21 : vector<16x1xf32>
    %c0_17 = arith.constant 0 : index
    %c0_18 = arith.constant 0 : index
    %23 = vector.load %arg8[%c0_17, %c0_18] : memref<16x1xf32, #tpu.memory_space<vmem>>, vector<16x1xf32>
    tpu.vector_store %arg8[%c0_17, %c0_18], %22 {strides = array<i32>} : memref<16x1xf32, #tpu.memory_space<vmem>>, vector<16x1xf32>,
    return
  }
  func.func @transform_0(%arg0: i32) -> (i32, i32) {
    %c0_i32 = arith.constant 0 : i32
    %c0_i32_0 = arith.constant 0 : i32
    return %arg0, %c0_i32 : i32, i32
  }
  func.func @transform_1(%arg0: i32) -> (i32, i32) {
    %c0_i32 = arith.constant 0 : i32
    %c0_i32_0 = arith.constant 0 : i32
    %c0_i32_1 = arith.constant 0 : i32
    return %c0_i32, %c0_i32_0 : i32, i32
  }
  func.func @transform_2(%arg0: i32) -> (i32, i32) {
    %c0_i32 = arith.constant 0 : i32
    %c0_i32_0 = arith.constant 0 : i32
    %c0_i32_1 = arith.constant 0 : i32
    return %c0_i32, %c0_i32_0 : i32, i32
  }
  func.func @transform_3(%arg0: i32) -> (i32, i32) {
    %c0_i32 = arith.constant 0 : i32
    %c0_i32_0 = arith.constant 0 : i32
    %c0_i32_1 = arith.constant 0 : i32
    return %c0_i32, %c0_i32_0 : i32, i32
  }
  func.func @transform_4(%arg0: i32) -> (i32, i32) {
    %c0_i32 = arith.constant 0 : i32
    %c0_i32_0 = arith.constant 0 : i32
    %c0_i32_1 = arith.constant 0 : i32
    return %c0_i32, %c0_i32_0 : i32, i32
  }
  func.func @transform_5(%arg0: i32) -> (i32, i32) {
    %c0_i32 = arith.constant 0 : i32
    %c0_i32_0 = arith.constant 0 : i32
    %c0_i32_1 = arith.constant 0 : i32
    return %c0_i32, %c0_i32_0 : i32, i32
  }
  func.func @transform_6(%arg0: i32) -> (i32, i32) {
    %c0_i32 = arith.constant 0 : i32
    %c0_i32_0 = arith.constant 0 : i32
    %c0_i32_1 = arith.constant 0 : i32
    return %c0_i32, %c0_i32_0 : i32, i32
  }
  func.func @transform_7(%arg0: i32) -> (i32, i32) {
    %c0_i32 = arith.constant 0 : i32
    %c0_i32_0 = arith.constant 0 : i32
    return %arg0, %c0_i32 : i32, i32
  }
}

</mosaic_0001>

<bundles_post_ra>
// kernel: tpu_custom_call.1
= control target key start
LH: loop header
LB: loop body
LE: loop exit
PB: predicated region body
PF: predicated region fallthrough
CT: control target
= control target key end

     0   :  { %s903_s0 = inlined_call_operand.vmem [shape: f32[48,24], index: 0, kind: input, shape index: {}]   ;;  %s904_s1 = inlined_call_operand.vmem [shape: f32[24,128], index: 1, kind: input, shape index: {}]   ;;  %s905_s2 = inlined_call_operand.vmem [shape: f32[1,128], index: 2, kind: input, shape index: {}]   ;;  %s906_s3 = inlined_call_operand.hbm [shape: f32[128,128], index: 3, kind: input, shape index: {}]   ;;  %s907_s4 = inlined_call_operand.vmem [shape: f32[1,128], index: 4, kind: input, shape index: {}]   ;;  %s908_s5 = inlined_call_operand.vmem [shape: f32[1,128], index: 5, kind: input, shape index: {}]   ;;  %s909_s6 = inlined_call_operand.<no memory space> [shape: f32[1,1], index: 6, kind: input, shape index: {}]   ;;  %s910_s7 = inlined_call_operand.vmem [shape: f32[48,1], index: 7, kind: output, shape index: {}]  }
   0x1   :  { %v12_v0 = vstv %s909_s6 }
   0x2   :  { %13 = vst [vmem:[#allocation2] sm:$0x1] %v12_v0 }
   0x3   :  { %14 = vsyncpa [#allocation4], 0  ;;  %s817_s26 = smov 0  }
   0x4 LB: > { %s588_s27 = sadd.s32 4294967295, %s769_s26   ;;  %p590_p0 = scmp.ge.s32.totalorder %s769_s26, 1  ;;  %s769_s26 = sphi %s817_s26, %s20_s26  }
   0x5   : > { %p203_p1 = scmp.lt.s32.totalorder %s769_s26, 4  ;;  %s771_s28 = smov [#allocation3]  }
   0x6   : > { %s221_s29 = sshll.u32 %s771_s28, 4  ;;  %p831_p3 = scmp.eq.s32.totalorder %s588_s27, 0  ;;  %s222_s29 = int_to_ptr.vmem [resolvable:$true] %s221_s29 }
   0x7   : > { %p825_p2 = pnand %p590_p0, %p203_p1  ;;  %s731_s11 = scalar_lea.hbm %s906_s3, 2048 }
   0x8   : > { %s915_s30 = scalar_select %p831_p3, 1, 0 }
   0x9   : > { %s914_s6 = scalar_select %p825_p2, 1, 0 }
   0xa   : > { %p714_p4 = pneg %p825_p2  ;;  %p732_p6 = scmp.ne.s32.totalorder %s906_s3, %s731_s11 }
   0xb   : > { %p738_p10 = scmp.lt.u32.totalorder %s731_s11, %s906_s3 }
   0xc   : > { %p839_p5 = pnand %p831_p3, %p714_p4 }
   0xe   : > { %p733_p7 = pneg %p839_p5 }
  0x10   : > { %p734_p8 = pnand %p733_p7, %p732_p6 }
  0x12   : > { %p735_p9 = pneg %p734_p8 }
  0x14   : > { %p740_p11 = pnand %p738_p10, %p735_p9 }
  0x16   : > { %743 = shalt.err (!%p740_p11)
}
  0x17   : > { %s744_s16 = scalar_lea.vmem %s222_s29, 2048  ;;  %p752_p1 = scmp.lt.s32.totalorder %s222_s29, %s222_s29 }
  0x18   : > { %p745_p12 = scmp.ne.s32.totalorder %s222_s29, %s744_s16  ;;  %p753_p4 = scmp.lt.s32.totalorder %s744_s16, %s744_s16 }
  0x1a   : > { %p747_p13 = pnand %p745_p12, %p733_p7  ;;  %p754_p3 = por %p753_p4, %p752_p1 }
  0x1c   : > { %p748_p0 = pneg %p747_p13 }
  0x1e   : > { %p755_p2 = pnand %p754_p3, %p748_p0 }
  0x20   : > { %758 = shalt.err (!%p755_p2)
}
  0x21   : > { %s772_s17 = smov 128   ;;  %s773_s18 = smov 8  }
  0x22   : > { %717 = dma.hbm_to_vmem [thread:$0]  (!%p839_p5), %s906_s3, 2048, %s222_s29, [#allocation4], %s772_s17, %s772_s17, %s773_s18  }
  0x23   : > { %p917_p6 = scmp.ne.s32.totalorder %s914_s6, 0 }
  0x24   : > { %p918_p8 = scmp.ne.s32.totalorder (!%p917_p6), %s915_s30, 0 }
  0x25   : > { %255 = sbr.rel (%p917_p6) target bundleno = 640 (0x280), region = 48 }
  0x2c   : > { %764 = dma.done.wait (%p918_p8), [#allocation4], 2048  }
  0x2d   : > { %766 = vsyncadd (%p918_p8), [#allocation4], 4294965248  ;;  %s595_s21 = sshll.u32 %s588_s27, 1  ;;  %vm311_vm0 = vcmask 195584   ;;  %v301_v1 = vld [vmem:[%s904_s1] sm:$0xff]  ;;  %v302_v2 = vld [vmem:[%s904_s1 + $0x8] sm:$0xff] }
  0x2e   : > { %p288_p2 = scmp.lt.s32.totalorder %s595_s21, 5  ;;  %v674_v3 = vpack.c.bf16 %v302_v2, %v301_v1  ;;  %v303_v4 = vld [vmem:[%s904_s1 + $0x10] sm:$0xff]  ;;  %v395_v6 = vld [vmem:[#allocation3] sm:$0xff]  ;;  %v398_v9 = vld [vmem:[#allocation3 + $0x18] sm:$0xff]  ;;  %vm517_vm1 = vcmask 7168  }
  0x2f   : > { %v396_v7 = vld [vmem:[#allocation3 + $0x8] sm:$0xff]  ;;  %v397_v8 = vld [vmem:[#allocation3 + $0x10] sm:$0xff]  ;;  %v399_v12 = vld [vmem:[#allocation3 + $0x20] sm:$0xff] }
  0x30   : > { %s920_s21 = smov (!%p288_p2, %s595_s21), 5  ;;  %675 = vmatprep.subr.bf16.mxu0 %v674_v3  ;;  %v678_v10 = vpack.c.bf16 %v396_v7, %v395_v6  ;;  %v682_v11 = vpack.c.bf16 %v398_v9, %v397_v8  ;;  %v400_v13 = vld [vmem:[#allocation3 + $0x28] sm:$0xff]  ;;  %v401_v16 = vld [vmem:[#allocation3 + $0x30] sm:$0xff]  ;;  %v402_v17 = vld [vmem:[#allocation3 + $0x38] sm:$0xff] }
  0x31   : > { %s596_s22 = sshll.u32 %s920_s21, 3  ;;  %677 = vmatpush3.bf16.msra.mxu0 %v674_v3  ;;  %v686_v15 = vpack.c.bf16 %v400_v13, %v399_v12  ;;  %v690_v18 = vpack.c.bf16 %v402_v17, %v401_v16  ;;  %v403_v19 = vld [vmem:[#allocation3 + $0x40] sm:$0xff]  ;;  %v404_v20 = vld [vmem:[#allocation3 + $0x48] sm:$0xff]  ;;  %v405_v22 = vld [vmem:[#allocation3 + $0x50] sm:$0xff] }
  0x32   : > { %s291_s25 = scalar_lea.vmem %s903_s0, %s596_s22  ;;  %634 = vmatprep.subr.mxu0 %v303_v4  ;;  %679 = vmatprep.subr.bf16.mxu1 %v678_v10  ;;  %v694_v21 = vpack.c.bf16 %v404_v20, %v403_v19  ;;  %v406_v23 = vld [vmem:[#allocation3 + $0x58] sm:$0xff]  ;;  %v407_v25 = vld [vmem:[#allocation3 + $0x60] sm:$0xff]  ;;  %v408_v26 = vld [vmem:[#allocation3 + $0x68] sm:$0xff]  ;;  %s297_s17 = scalar_lea.vmem %s910_s7, %s596_s22 }
  0x33   : > { %v299_v5 = vld [vmem:[%s291_s25] sm:$0xff]  ;;  %v300_v14 = vld [vmem:[%s291_s25 + $0x8] sm:$0xff]  ;;  %681 = vmatpush3.bf16.msra.mxu1 %v678_v10  ;;  %v698_v24 = vpack.c.bf16 %v406_v23, %v405_v22  ;;  %v702_v27 = vpack.c.bf16 %v408_v26, %v407_v25  ;;  %v409_v28 = vld [vmem:[#allocation3 + $0x70] sm:$0xff] }
  0x34   : > { %636 = vmatprep.mubr.msk.f32.mxu0 %vm311_vm0, %v299_v5  ;;  %683 = vmatprep.subr.bf16.mxu1 %v682_v11  ;;  %v410_v29 = vld [vmem:[#allocation3 + $0x78] sm:$0xff] }
  0x35   : > { %635 = vmatpush3.msra.mxu0 %v303_v4  ;;  %v706_v30 = vpack.c.bf16 %v410_v29, %v409_v28  ;;  %v599_v31 = vld [vmem:[%s905_s2] ss:$0 sm:$0xff] }
  0x36   : > { %637 = vmatmul.mubr.msk.f32.vlgmr.msra.gmra.mrb[0].mxu0 %vm311_vm0, %v300_v14  ;;  %v602_v38 = vld [vmem:[%s907_s4] ss:$0 sm:$0xff] }
  0x37   : > { %685 = vmatpush3.bf16.msra.mxu1 %v682_v11  ;;  %v603_v43 = vld [vmem:[%s908_s5] ss:$0 sm:$0xff] }
  0x38   : > { %687 = vmatprep.subr.bf16.mxu1 %v686_v15  ;;  %v604_v48 = vld [vmem:[#allocation2] ss:$0 sm:$0xff] }
  0x3b   : > { %689 = vmatpush3.bf16.msra.mxu1 %v686_v15 }
  0x3c   : > { %691 = vmatprep.subr.bf16.mxu1 %v690_v18 }
  0x3f   : > { %693 = vmatpush3.bf16.msra.mxu1 %v690_v18 }
  0x40   : > { %695 = vmatprep.subr.bf16.mxu1 %v694_v21 }
  0x43   : > { %697 = vmatpush3.bf16.msra.mxu1 %v694_v21 }
  0x44   : > { %699 = vmatprep.subr.bf16.mxu1 %v698_v24 }
  0x47   : > { %701 = vmatpush3.bf16.msra.mxu1 %v698_v24 }
  0x48   : > { %703 = vmatprep.subr.bf16.mxu1 %v702_v27 }
  0x4b   : > { %705 = vmatpush3.bf16.msra.mxu1 %v702_v27 }
  0x4c   : > { %707 = vmatprep.subr.bf16.mxu1 %v706_v30 }
  0x4f   : > { %709 = vmatpush3.bf16.msra.mxu1 %v706_v30 }
 0x109   : > { %v638_v32 = vpop.f32.mrb[0].mxu0 }
 0x10a   : > { %v390_v33 = vadd.f32 %v638_v32, %v599_v31  ;;  %v384_v34 = vpop.f32.mrb[1].mxu0 }
 0x10b   : > { %v385_v35 = vadd.f32 %v599_v31, %v384_v34 }
 0x10c   : > { %v394_v37 = vmax.f32 %v390_v33, 0.0 }
 0x10d   : > { %v393_v36 = vmax.f32 %v385_v35, 0.0 }
 0x10f   : > { %671 = vmatprep.mubr.f32.mxu1 %v393_v36 }
 0x110   : > { %672 = vmatmul.mubr.f32.vlgmr.msra.gmra.mrb[0].mxu1 %v394_v37 }
 0x1e3   : > { %v673_v39 = vpop.f32.mrb[0].mxu1 }
 0x1e4   : > { %v484_v40 = vpop.f32.mrb[1].mxu1  ;;  %v490_v41 = vadd.f32 %v673_v39, %v602_v38 }
 0x1e5   : > { %v485_v42 = vadd.f32 %v602_v38, %v484_v40 }
 0x1e6   : > { %v494_v45 = vmax.f32 %v490_v41, 0.0 }
 0x1e7   : > { %v493_v44 = vmax.f32 %v485_v42, 0.0 }
 0x1e8   : > { %v503_v47 = vmul.f32 %v603_v43, %v494_v45 }
 0x1e9   : > { %v502_v46 = vmul.f32 %v603_v43, %v493_v44 }
 0x1eb   : > { %504 = vadd.xlane.f32.xlu0 %v502_v46 }
 0x1ef   : > { %506 = vadd.xlane.f32.xlu0 %v503_v47 }
 0x278   : > { %v505_v49 = vpop.xlane.xlu0 %504 }
 0x279   : > { %v515_v50 = vadd.f32 %v604_v48, %v505_v49 }
 0x27b   : > { %518 = vst.msk [vmem:[%s297_s17] sm:$0xff] %vm517_vm1, %v515_v50 }
 0x27c   : > { %v507_v51 = vpop.xlane.xlu0 %506 }
 0x27d   : > { %v516_v52 = vadd.f32 %v604_v48, %v507_v51 }
 0x27f   : > { %519 = vst.msk [vmem:[%s297_s17 + $0x8] sm:$0xff] %vm517_vm1, %v516_v52 }
 0x280 PF: > { %s20_s26 = sadd.s32 1, %s769_s26  }
 0x281   : > { %p17_p3 = scmp.ge.s32.totalorder %s20_s26, 5  }
 0x283   :  { %19 = sbr.rel (!%p17_p3) target bundleno = 4 (0x4), region = 83 }
 0x28a   :  { %542 = vsyncpa [#allocation4], 1 }
 0x28b   :  { %544 = vsyncpa [#allocation4 + $0x1], 1 }

</bundles_post_ra>
